<compile_context>
chip_gen: v7x
topology: tpu7x:2x2x1
jax: 0.10.0
libtpu: 0.0.40
codegen_flags: <defaults>
</compile_context>

<pallas_src>
import jax
import jax.numpy as jnp
from jax.experimental import pallas as pl
from jax.experimental.pallas import tpu as pltpu

LANE = 128


def _num_tensorcores() -> int:
    """Best-effort: 2 on v7x (two TensorCores per chip), else 1 (always safe)."""
    try:
        info = pltpu.get_tpu_info()
        ver = getattr(info, "chip_version", None)
        if ver is not None and "7" in str(ver):
            return 2
    except Exception:
        pass
    try:
        if "v7" in jax.devices()[0].device_kind.lower():
            return 2
    except Exception:
        pass
    return 1


def _make_contrastive_kernel(margin: float, rows: int, tile_r: int):
    margin = float(margin)
    n_chunks = tile_r // 8  # tile_r is always a multiple of 8

    def kernel(dis_ref, label_ref, out_ref, acc_ref):
        c = pl.program_id(0)          # core (parallel) axis
        i = pl.program_id(1)          # per-core reduction steps
        n_i = pl.num_programs(1)

        @pl.when(i == 0)
        def _():
            acc_ref[...] = jnp.zeros_like(acc_ref)

        d = dis_ref[...].astype(jnp.float32)
        lab = label_ref[...].astype(jnp.float32)
        hinge = jnp.maximum(margin - d, 0.0)
        # Original formula (exact for fractional labels too).  Note
        # term(d=0, label=0) == 0, so zero-padded lanes/rows contribute 0.
        term = (1.0 - lab) * d * d + lab * hinge * hinge

        blk = c * n_i + i              # UNclamped block index
        row0 = blk * tile_r
        in_bounds = row0 + tile_r <= rows

        def accumulate(t):
            # Chunk-reduce the tile into a single (8, 128) vreg accumulator:
            # same number of VPU adds, ~tile_r/8x less accumulator traffic.
            acc_ref[...] += jnp.sum(t.reshape(n_chunks, 8, LANE), axis=0)

        # Fast path: fully in-bounds block -> no mask math at all.
        @pl.when(in_bounds)
        def _():
            accumulate(term)

        # Slow path: ragged last block, or a clamped duplicate block from an
        # over-provisioned (core, step) pair.  Mask per ROW against the
        # unclamped global row index (lane padding is already zero-valued);
        # jnp.where is a select, so OOB garbage (even NaN) never propagates.
        @pl.when(jnp.logical_not(in_bounds))
        def _():
            rid = jax.lax.broadcasted_iota(jnp.int32, term.shape, 0) + row0
            accumulate(jnp.where(rid < rows, term, 0.0))

        @pl.when(i == n_i - 1)
        def _():
            # Lane-dense (8, 128) per-core partial sums; the wrapper finishes
            # the scalar reduce and the mean.
            out_ref[0] = acc_ref[...]

    return kernel


def contrastive_loss(dis: jax.Array, label: jax.Array, margin: float = 2.0,
                     *, num_cores=None, max_tile_rows: int = 8192) -> jax.Array:
    """Scalar f32 loss matching PyTorch ContrastiveLoss.forward."""
    assert dis.shape == label.shape
    n_elems = int(dis.size)
    assert n_elems > 0

    flat_d = dis.reshape(-1)
    flat_l = label.reshape(-1)

    # Zero-copy fast path when n % 128 == 0 and rows >= 8; otherwise pad the
    # lane tail (and tiny inputs up to 8 rows) with zeros.  All pad slots give
    # term == 0, so the sum is unchanged.
    # TODO(synk): a manual-DMA (pl.ANY) tail path could avoid this pad copy
    # entirely for ragged sizes.
    pad_to = max(pl.cdiv(n_elems, LANE) * LANE, 8 * LANE)
    pad = pad_to - n_elems
    if pad:
        flat_d = jnp.concatenate([flat_d, jnp.zeros((pad,), flat_d.dtype)])
        flat_l = jnp.concatenate([flat_l, jnp.zeros((pad,), flat_l.dtype)])
    rows = pad_to // LANE
    d2 = flat_d.reshape(rows, LANE)
    l2 = flat_l.reshape(rows, LANE)

    # Fixed tile, multiple of 8 sublanes; ragged last block is masked in-kernel.
    tile_r = min(int(max_tile_rows) // 8 * 8, (rows // 8) * 8)
    tile_r = max(tile_r, 8)

    total_blocks = pl.cdiv(rows, tile_r)
    if num_cores is None:
        num_cores = _num_tensorcores()
    num_cores = max(1, min(int(num_cores), total_blocks))
    n_i = pl.cdiv(total_blocks, num_cores)
    max_blk = total_blocks - 1

    def in_map(c, i):
        # Clamp so over-provisioned (core, step) pairs re-read a valid block;
        # those blocks are fully masked inside the kernel (unclamped rid >= rows).
        return (jnp.minimum(c * n_i + i, max_blk), 0)

    kernel = _make_contrastive_kernel(margin, rows, tile_r)

    # VMEM budget: both inputs double-buffered + headroom, capped for v7x's
    # 64 MiB physical VMEM; always set explicitly (v5e scoped default is 16 MiB).
    blk_bytes = tile_r * LANE * (d2.dtype.itemsize + l2.dtype.itemsize)
    vmem_limit = int(min(48 * 2**20, max(32 * 2**20, 2 * blk_bytes + (4 << 20))))

    out = pl.pallas_call(
        kernel,
        out_shape=jax.ShapeDtypeStruct((num_cores, 8, LANE), jnp.float32),
        grid_spec=pltpu.PrefetchScalarGridSpec(
            num_scalar_prefetch=0,
            grid=(num_cores, n_i),
            in_specs=[
                pl.BlockSpec((tile_r, LANE), in_map),
                pl.BlockSpec((tile_r, LANE), in_map),
            ],
            out_specs=pl.BlockSpec((1, 8, LANE), lambda c, i: (c, 0, 0)),
            scratch_shapes=[pltpu.VMEM((8, LANE), jnp.float32)],
        ),
        compiler_params=pltpu.CompilerParams(
            dimension_semantics=("parallel", "arbitrary"),
            vmem_limit_bytes=vmem_limit,
        ),
        cost_estimate=pl.CostEstimate(
            flops=8 * n_elems,
            transcendentals=0,
            bytes_accessed=int(d2.size) * d2.dtype.itemsize
                         + int(l2.size) * l2.dtype.itemsize
                         + num_cores * 8 * LANE * 4,
        ),
    )(d2, l2)

    # Every valid element landed in exactly one accumulator slot (padding and
    # masked slots are zero), so a plain sum finishes the reduction.
    return jnp.sum(out) * (1.0 / float(n_elems))


def _reference(dis, label, margin):
    return jnp.mean((1.0 - label) * dis ** 2
                    + label * jnp.maximum(margin - dis, 0.0) ** 2)


if __name__ == "__main__":
    key = jax.random.PRNGKey(0)
    k1, k2, k3, k4, k5, k6 = jax.random.split(key, 6)
    margin = 2.0

    # Typical module usage: per-pair distances and binary labels for a small
    # batch of pairs (exercises the tiny / ragged pad path).
    batch = 8
    dis = jax.random.uniform(k1, (batch,), dtype=jnp.float32) * 3.0
    label = jax.random.bernoulli(k2, 0.5, (batch,)).astype(jnp.float32)
    loss = jax.block_until_ready(contrastive_loss(dis, label, margin))
    ref = _reference(dis, label, margin)
    assert jnp.allclose(loss, ref, rtol=1e-5, atol=1e-5), (loss, ref)

    # Lane-aligned case (zero-copy view) with a ragged last block
    # (rows=20, tile_r=16) -> exercises the gated row-mask slow path.
    dis2 = jax.random.uniform(k3, (20, 128), dtype=jnp.float32) * 3.0
    label2 = jax.random.bernoulli(k4, 0.5, (20, 128)).astype(jnp.float32)
    loss2 = jax.block_until_ready(contrastive_loss(dis2, label2, margin))
    ref2 = _reference(dis2, label2, margin)
    assert jnp.allclose(loss2, ref2, rtol=1e-5, atol=1e-5), (loss2, ref2)

    # Fully ragged shape, fractional labels (original algebra kept exact).
    dis3 = jax.random.uniform(k5, (7, 19), dtype=jnp.float32) * 3.0
    label3 = jax.random.uniform(k6, (7, 19), dtype=jnp.float32)
    loss3 = jax.block_until_ready(contrastive_loss(dis3, label3, margin))
    ref3 = _reference(dis3, label3, margin)
    assert jnp.allclose(loss3, ref3, rtol=1e-5, atol=1e-5), (loss3, ref3)

    print("KERNEL_OK")
</pallas_src>

<mosaic_0001>
module attributes {stable_mosaic.version = 11 : i64} {
  func.func @kernel(%arg0: i32, %arg1: i32, %arg2: memref<8x128xf32, #tpu.memory_space<vmem>>, %arg3: memref<8x128xf32, #tpu.memory_space<vmem>>, %arg4: memref<1x8x128xf32, #tpu.memory_space<vmem>>, %arg5: memref<8x128xf32, #tpu.memory_space<vmem>>) attributes {dimension_semantics = [#tpu.dimension_semantics<parallel>, #tpu.dimension_semantics<arbitrary>], iteration_bounds = array<i64: 1, 1>, scalar_prefetch = 0 : i64, scratch_operands = 1 : i64, tpu.core_type = #tpu.core_type<tc>, window_params = [{transform_indices = @transform_0, window_bounds = array<i64: 8, 128>}, {transform_indices = @transform_1, window_bounds = array<i64: 8, 128>}, {transform_indices = @transform_2, window_bounds = array<i64: 1, 8, 128>}]} {
    %c0_i32 = arith.constant 0 : i32
    %0 = arith.cmpi eq, %arg1, %c0_i32 : i32
    %1 = arith.extui %0 : i1 to i32
    %c0_i32_0 = arith.constant 0 : i32
    %2 = arith.cmpi ne, %1, %c0_i32_0 : i32
    scf.if %2 {
      %cst_12 = arith.constant 0.000000e+00 : f32
      %29 = vector.broadcast %cst_12 : f32 to vector<8x128xf32>
      %c0_13 = arith.constant 0 : index
      %c0_14 = arith.constant 0 : index
      %30 = vector.load %arg5[%c0_13, %c0_14] : memref<8x128xf32, #tpu.memory_space<vmem>>, vector<8x128xf32>
      tpu.vector_store %arg5[%c0_13, %c0_14], %29 {strides = array<i32>} : memref<8x128xf32, #tpu.memory_space<vmem>>, vector<8x128xf32>,
    } else {
    }
    %c0 = arith.constant 0 : index
    %c0_1 = arith.constant 0 : index
    %3 = vector.load %arg2[%c0, %c0_1] : memref<8x128xf32, #tpu.memory_space<vmem>>, vector<8x128xf32>
    %c0_2 = arith.constant 0 : index
    %c0_3 = arith.constant 0 : index
    %4 = vector.load %arg3[%c0_2, %c0_3] : memref<8x128xf32, #tpu.memory_space<vmem>>, vector<8x128xf32>
    %cst = arith.constant 2.000000e+00 : f32
    %5 = vector.broadcast %cst : f32 to vector<8x128xf32>
    %6 = arith.subf %5, %3 : vector<8x128xf32>
    %cst_4 = arith.constant 0.000000e+00 : f32
    %7 = vector.broadcast %cst_4 : f32 to vector<8x128xf32>
    %8 = arith.maximumf %6, %7 : vector<8x128xf32>
    %cst_5 = arith.constant 1.000000e+00 : f32
    %9 = vector.broadcast %cst_5 : f32 to vector<8x128xf32>
    %10 = arith.subf %9, %4 : vector<8x128xf32>
    %11 = arith.mulf %10, %3 : vector<8x128xf32>
    %12 = arith.mulf %11, %3 : vector<8x128xf32>
    %13 = arith.mulf %4, %8 : vector<8x128xf32>
    %14 = arith.mulf %13, %8 : vector<8x128xf32>
    %15 = arith.addf %12, %14 : vector<8x128xf32>
    %c1_i32 = arith.constant 1 : i32
    %16 = arith.muli %arg0, %c1_i32 : i32
    %17 = arith.addi %16, %arg1 : i32
    %c8_i32 = arith.constant 8 : i32
    %18 = arith.muli %17, %c8_i32 : i32
    %c8_i32_6 = arith.constant 8 : i32
    %19 = arith.addi %18, %c8_i32_6 : i32
    %c8_i32_7 = arith.constant 8 : i32
    %20 = arith.cmpi sle, %19, %c8_i32_7 : i32
    %21 = arith.extui %20 : i1 to i32
    %c0_i32_8 = arith.constant 0 : i32
    %22 = arith.cmpi ne, %21, %c0_i32_8 : i32
    scf.if %22 {
      %c0_12 = arith.constant 0 : index
      %c0_13 = arith.constant 0 : index
      %29 = vector.load %arg5[%c0_12, %c0_13] : memref<8x128xf32, #tpu.memory_space<vmem>>, vector<8x128xf32>
      %30 = vector.shape_cast %15 : vector<8x128xf32> to vector<1x8x128xf32>
      %cst_14 = arith.constant dense<0.000000e+00> : vector<8x128xf32>
      %31 = vector.multi_reduction <add>, %30, %cst_14 [0] : vector<1x8x128xf32> to vector<8x128xf32>
      %32 = arith.addf %29, %31 : vector<8x128xf32>
      %c0_15 = arith.constant 0 : index
      %c0_16 = arith.constant 0 : index
      %33 = vector.load %arg5[%c0_15, %c0_16] : memref<8x128xf32, #tpu.memory_space<vmem>>, vector<8x128xf32>
      tpu.vector_store %arg5[%c0_15, %c0_16], %32 {strides = array<i32>} : memref<8x128xf32, #tpu.memory_space<vmem>>, vector<8x128xf32>,
    } else {
    }
    %true = arith.constant true
    %23 = arith.xori %20, %true : i1
    %24 = arith.extui %23 : i1 to i32
    %c0_i32_9 = arith.constant 0 : i32
    %25 = arith.cmpi ne, %24, %c0_i32_9 : i32
    scf.if %25 {
      %29 = tpu.iota {dimensions = array<i32: 0>} : vector<8x128xi32>
      %30 = vector.broadcast %18 : i32 to vector<8x128xi32>
      %31 = arith.addi %29, %30 : vector<8x128xi32>
      %c8_i32_12 = arith.constant 8 : i32
      %32 = vector.broadcast %c8_i32_12 : i32 to vector<8x128xi32>
      %33 = arith.cmpi slt, %31, %32 : vector<8x128xi32>
      %cst_13 = arith.constant 0.000000e+00 : f32
      %34 = vector.broadcast %cst_13 : f32 to vector<8x128xf32>
      %35 = arith.select %33, %15, %34 : vector<8x128xi1>, vector<8x128xf32>
      %c0_14 = arith.constant 0 : index
      %c0_15 = arith.constant 0 : index
      %36 = vector.load %arg5[%c0_14, %c0_15] : memref<8x128xf32, #tpu.memory_space<vmem>>, vector<8x128xf32>
      %37 = vector.shape_cast %35 : vector<8x128xf32> to vector<1x8x128xf32>
      %cst_16 = arith.constant dense<0.000000e+00> : vector<8x128xf32>
      %38 = vector.multi_reduction <add>, %37, %cst_16 [0] : vector<1x8x128xf32> to vector<8x128xf32>
      %39 = arith.addf %36, %38 : vector<8x128xf32>
      %c0_17 = arith.constant 0 : index
      %c0_18 = arith.constant 0 : index
      %40 = vector.load %arg5[%c0_17, %c0_18] : memref<8x128xf32, #tpu.memory_space<vmem>>, vector<8x128xf32>
      tpu.vector_store %arg5[%c0_17, %c0_18], %39 {strides = array<i32>} : memref<8x128xf32, #tpu.memory_space<vmem>>, vector<8x128xf32>,
    } else {
    }
    %c0_i32_10 = arith.constant 0 : i32
    %26 = arith.cmpi eq, %arg1, %c0_i32_10 : i32
    %27 = arith.extui %26 : i1 to i32
    %c0_i32_11 = arith.constant 0 : i32
    %28 = arith.cmpi ne, %27, %c0_i32_11 : i32
    scf.if %28 {
      %c0_12 = arith.constant 0 : index
      %c0_13 = arith.constant 0 : index
      %29 = vector.load %arg5[%c0_12, %c0_13] : memref<8x128xf32, #tpu.memory_space<vmem>>, vector<8x128xf32>
      %c0_14 = arith.constant 0 : index
      %c0_15 = arith.constant 0 : index
      %c0_16 = arith.constant 0 : index
      %30 = vector.load %arg4[%c0_14, %c0_15, %c0_16] : memref<1x8x128xf32, #tpu.memory_space<vmem>>, vector<1x8x128xf32>
      %31 = vector.shape_cast %30 : vector<1x8x128xf32> to vector<8x128xf32>
      %32 = vector.shape_cast %29 : vector<8x128xf32> to vector<1x8x128xf32>
      tpu.vector_store %arg4[%c0_14, %c0_15, %c0_16], %32 {strides = array<i32>} : memref<1x8x128xf32, #tpu.memory_space<vmem>>, vector<1x8x128xf32>,
    } else {
    }
    return
  }
  func.func @transform_0(%arg0: i32, %arg1: i32) -> (i32, i32) {
    %c1_i32 = arith.constant 1 : i32
    %0 = arith.muli %arg0, %c1_i32 : i32
    %1 = arith.addi %0, %arg1 : i32
    %c0_i32 = arith.constant 0 : i32
    %2 = arith.minsi %1, %c0_i32 : i32
    %c0_i32_0 = arith.constant 0 : i32
    %c0_i32_1 = arith.constant 0 : i32
    return %2, %c0_i32_0 : i32, i32
  }
  func.func @transform_1(%arg0: i32, %arg1: i32) -> (i32, i32) {
    %c1_i32 = arith.constant 1 : i32
    %0 = arith.muli %arg0, %c1_i32 : i32
    %1 = arith.addi %0, %arg1 : i32
    %c0_i32 = arith.constant 0 : i32
    %2 = arith.minsi %1, %c0_i32 : i32
    %c0_i32_0 = arith.constant 0 : i32
    %c0_i32_1 = arith.constant 0 : i32
    return %2, %c0_i32_0 : i32, i32
  }
  func.func @transform_2(%arg0: i32, %arg1: i32) -> (i32, i32, i32) {
    %c0_i32 = arith.constant 0 : i32
    %c0_i32_0 = arith.constant 0 : i32
    %c0_i32_1 = arith.constant 0 : i32
    return %arg0, %c0_i32, %c0_i32_0 : i32, i32, i32
  }
}

</mosaic_0001>

<bundles_post_ra>
// kernel: tpu_custom_call.1
= control target key start
LH: loop header
LB: loop body
LE: loop exit
PB: predicated region body
PF: predicated region fallthrough
CT: control target
= control target key end

     0   :  { %7 = vsyncpa [#allocation4], 0  ;;  %s246_s0 = inlined_call_operand.hbm [shape: f32[8,128], index: 0, kind: input, shape index: {}]   ;;  %s247_s1 = inlined_call_operand.hbm [shape: f32[8,128], index: 1, kind: input, shape index: {}]   ;;  %s248_s2 = inlined_call_operand.hbm [shape: f32[1,8,128], index: 2, kind: output, shape index: {}]  }
   0x1   :  { %8 = vsyncpa [#allocation7], 0 }
   0x2   :  { %9 = vsyncpa [#allocation5], 0  ;;  %s192_s9 = smov [#allocation3]   ;;  %s193_s11 = smov [#allocation6]  }
   0x3   :  { %s21_s10 = sshll.u32 %s192_s9, 4  ;;  %s36_s12 = sshll.u32 %s193_s11, 4  ;;  %s22_s10 = int_to_ptr.vmem [resolvable:$true] %s21_s10  ;;  %s37_s12 = int_to_ptr.vmem [resolvable:$true] %s36_s12 }
   0x4   :  { %s120_s15 = scalar_lea.hbm %s246_s0, 128 }
   0x5   :  { %p121_p0 = scmp.ne.s32.totalorder %s246_s0, %s120_s15  ;;  %p124_p1 = scmp.lt.u32.totalorder %s120_s15, %s246_s0 }
   0x7   :  { %p126_p2 = pnand %p124_p1, %p121_p0 }
   0x9   :  { %129 = shalt.err (!%p126_p2)
}
   0xa   :  { %s130_s20 = scalar_lea.vmem %s22_s10, 128  ;;  %p135_p4 = scmp.lt.s32.totalorder %s22_s10, %s22_s10 }
   0xb   :  { %p131_p3 = scmp.ne.s32.totalorder %s22_s10, %s130_s20  ;;  %p136_p5 = scmp.lt.s32.totalorder %s130_s20, %s130_s20 }
   0xd   :  { %p137_p6 = por %p136_p5, %p135_p4 }
   0xf   :  { %p138_p7 = pnand %p137_p6, %p131_p3 }
  0x11   :  { %141 = shalt.err (!%p138_p7)
}
  0x12   :  { %24 = dma.hbm_to_vmem [thread:$0]  %s246_s0, 128, %s22_s10, [#allocation4]  }
  0x13   :  { %s142_s25 = scalar_lea.hbm %s247_s1, 128 }
  0x14   :  { %p143_p8 = scmp.ne.s32.totalorder %s247_s1, %s142_s25  ;;  %p146_p9 = scmp.lt.u32.totalorder %s142_s25, %s247_s1 }
  0x16   :  { %p148_p10 = pnand %p146_p9, %p143_p8 }
  0x18   :  { %151 = shalt.err (!%p148_p10)
}
  0x19   :  { %s152_s30 = scalar_lea.vmem %s37_s12, 128  ;;  %p157_p12 = scmp.lt.s32.totalorder %s37_s12, %s37_s12 }
  0x1a   :  { %p153_p11 = scmp.ne.s32.totalorder %s37_s12, %s152_s30  ;;  %p158_p13 = scmp.lt.s32.totalorder %s152_s30, %s152_s30 }
  0x1c   :  { %p159_p0 = por %p158_p13, %p157_p12 }
  0x1e   :  { %p160_p1 = pnand %p159_p0, %p153_p11 }
  0x20   :  { %163 = shalt.err (!%p160_p1)
}
  0x21   :  { %39 = dma.hbm_to_vmem [thread:$0]  %s247_s1, 128, %s37_s12, [#allocation7]  }
  0x22   :  { %186 = dma.done.wait [#allocation4], 128  }
  0x23   :  { %187 = vsyncadd [#allocation4], 4294967168 }
  0x24   :  { %188 = dma.done.wait [#allocation7], 128  }
  0x25   :  { %189 = vsyncadd [#allocation7], 4294967168  ;;  %v57_v0 = vld [vmem:[#allocation3] sm:$0xff]  ;;  %v58_v1 = vld [vmem:[#allocation6] sm:$0xff]  ;;  %s194_s4 = smov [#allocation8]  }
  0x26   :  { %v59_v2 = vsub.f32 2.0, %v57_v0  ;;  %v61_v3 = vsub.f32 1.0, %v58_v1  ;;  %s103_s5 = sshll.u32 %s194_s4, 4  ;;  %s104_s5 = int_to_ptr.vmem [resolvable:$true] %s103_s5 }
  0x27   :  { %s164_s6 = scalar_lea.vmem %s104_s5, 128  ;;  %p169_p3 = scmp.lt.s32.totalorder %s104_s5, %s104_s5 }
  0x28   :  { %v60_v4 = vmax.f32 %v59_v2, 0.0  ;;  %v62_v5 = vmul.f32 %v61_v3, %v57_v0  ;;  %p165_p2 = scmp.ne.s32.totalorder %s104_s5, %s164_s6  ;;  %p170_p4 = scmp.lt.s32.totalorder %s164_s6, %s164_s6 }
  0x2a   :  { %v63_v6 = vmul.f32 %v62_v5, %v57_v0  ;;  %v64_v7 = vmul.f32 %v60_v4, %v58_v1  ;;  %p171_p5 = por %p170_p4, %p169_p3 }
  0x2c   :  { %v65_v8 = vmul.f32 %v64_v7, %v60_v4  ;;  %p172_p6 = pnand %p171_p5, %p165_p2 }
  0x2e   :  { %v66_v9 = vadd.f32 %v65_v8, %v63_v6 }
  0x30   :  { %96 = vst [vmem:[#allocation8] sm:$0xff] %v66_v9 }
  0x31   :  { %175 = shalt.err (!%p172_p6)
}
  0x32   :  { %s176_s8 = scalar_lea.hbm %s248_s2, 128 }
  0x33   :  { %p177_p7 = scmp.ne.s32.totalorder %s248_s2, %s176_s8  ;;  %p180_p8 = scmp.lt.u32.totalorder %s176_s8, %s248_s2 }
  0x35   :  { %p182_p9 = pnand %p180_p8, %p177_p7 }
  0x37   :  { %185 = shalt.err (!%p182_p9)
}
  0x38   :  { %106 = dma.vmem_to_hbm [thread:$0]  %s104_s5, 128, %s248_s2, [#allocation5]  }
  0x39   :  { %190 = dma.done.wait [#allocation5], 128  }
  0x3a   :  { %191 = vsyncadd [#allocation5], 4294967168 }
  0x3b   :  { %110 = vsyncpa [#allocation4], 1 }
  0x3c   :  { %111 = vsyncpa [#allocation7], 1 }
  0x3d   :  { %112 = vsyncpa [#allocation5], 1 }

</bundles_post_ra>
